<compile_context>
chip_gen: v7x
topology: tpu7x:2x2x1
jax: 0.10.0
libtpu: 0.0.40
codegen_flags: <defaults>
</compile_context>

<pallas_src>
import functools

import jax
import jax.numpy as jnp
from jax.experimental import pallas as pl
from jax.experimental.pallas import tpu as pltpu

LANE = 128            # vreg lane width
SUBLANE = 8           # f32 sublane quantum (params packing)
BATCH_QUANTUM = 16    # bf16-output sublane packing (also a multiple of 8)
_SMALL_BATCH_FASTPATH = 8   # Policy.act-style tiny batches skip the kernel


def _round_up(x, m):
    return ((x + m - 1) // m) * m


# ----------------------------------------------------------------------------
# Parameter packing: one lane-dense f32 array holding w1 / b1 / w2 / b2.
# ----------------------------------------------------------------------------
def pack_params(w1, b1, w2, b2):
    """Pack params into one (rows, 128) f32 array.

    Layout (each section starts on a sublane boundary):
      rows [0, s_size)          : w1, zero-padded to h_pad lanes
      row  r_b1                 : b1, zero-padded to h_pad lanes
      rows [r_w2, r_w2 + h_pad) : w2, zero-padded to a_pad lanes
      row  r_b2                 : b2 with lanes a_size..  pre-set to -1e30
                                  (padded w2 columns are zero, so padded
                                  logits == b2 == -1e30 -> exp underflows to
                                  exactly 0; no in-kernel mask needed).
    """
    s_size, h_size = w1.shape
    h2, a_size = w2.shape
    assert h2 == h_size

    h_pad = _round_up(h_size, LANE)
    a_pad = _round_up(a_size, LANE)
    w_pad = max(h_pad, a_pad)

    s_rows = _round_up(s_size, SUBLANE)
    r_b1 = s_rows
    r_w2 = s_rows + SUBLANE
    r_b2 = r_w2 + h_pad
    r_total = _round_up(r_b2 + 1, SUBLANE)

    params = jnp.zeros((r_total, w_pad), jnp.float32)
    params = params.at[0:s_size, 0:h_size].set(w1.astype(jnp.float32))
    params = params.at[r_b1, 0:h_size].set(b1.reshape(-1).astype(jnp.float32))
    params = params.at[r_w2:r_w2 + h_size, 0:a_size].set(w2.astype(jnp.float32))
    b2_row = jnp.full((w_pad,), -1e30, jnp.float32)
    b2_row = b2_row.at[0:a_size].set(b2.reshape(-1).astype(jnp.float32))
    params = params.at[r_b2, :].set(b2_row)

    layout = dict(s_size=s_size, h_size=h_size, a_size=a_size,
                  h_pad=h_pad, a_pad=a_pad,
                  r_b1=r_b1, r_w2=r_w2, r_b2=r_b2)
    return params, layout


# ----------------------------------------------------------------------------
# Kernel: one batch tile per grid step (fc1 + ReLU + fc2 + softmax, fused).
# ----------------------------------------------------------------------------
def _policy_kernel(x_ref, params_ref, out_ref, *,
                   s_size, a_size, h_pad, a_pad, r_b1, r_w2, r_b2):
    # bf16 MXU operands (fewer f32-emulation passes, biggest win on v5e);
    # accumulation stays f32 via preferred_element_type.
    x = x_ref[...].astype(jnp.bfloat16)                         # (B_BLK, s)
    w1 = params_ref[0:s_size, 0:h_pad].astype(jnp.bfloat16)     # (s, h_pad)
    b1 = params_ref[r_b1:r_b1 + 1, 0:h_pad]                     # (1, h_pad) f32
    w2 = params_ref[r_w2:r_w2 + h_pad, 0:a_pad].astype(jnp.bfloat16)
    b2 = params_ref[r_b2:r_b2 + 1, 0:a_pad]                     # (1, a_pad) f32
                                                                # (pre-masked)
    # fc1 + ReLU (padded hidden lanes stay exactly 0).
    h = jnp.dot(x, w1, preferred_element_type=jnp.float32) + b1
    h = jnp.maximum(h, 0.0).astype(jnp.bfloat16)

    # fc2; padded action lanes land at -1e30 via the pre-masked b2.
    logits = jnp.dot(h, w2, preferred_element_type=jnp.float32) + b2

    # Numerically stable softmax over dim=1; padded lanes -> exactly 0.
    m = jnp.max(logits, axis=1, keepdims=True)
    e = jnp.exp(logits - m)
    denom = jnp.sum(e, axis=1, keepdims=True)
    probs = e * pl.reciprocal(denom, approx=True)
    out_ref[...] = probs.astype(out_ref.dtype)


# ----------------------------------------------------------------------------
# Wrapper: pads batch, tiles over a parallel grid, returns the padded block.
# ----------------------------------------------------------------------------
_PARAMS_SINGLE_BUFFER_OK = None   # lazily probed: pipeline_mode=pl.Buffered(1)


def _params_spec(r_total, w_pad, single_buffer):
    idx = lambda i: (0, 0)
    if single_buffer:
        # Params block index is constant across the grid -> one pipeline
        # buffer is enough (saves the redundant second VMEM buffer/DMA slot).
        return pl.BlockSpec((r_total, w_pad), idx,
                            pipeline_mode=pl.Buffered(1))
    return pl.BlockSpec((r_total, w_pad), idx)


def policy_forward_padded(x, params, layout, *, b_block=1024):
    """Run the Pallas kernel.  Returns the lane-padded (b_pad, a_pad) bf16
    probabilities.  Rows >= B and columns >= a_size are padding; padded
    probability lanes are exactly 0, so consumers (sampling / log-prob) can
    use the padded block directly without a post-kernel slice."""
    global _PARAMS_SINGLE_BUFFER_OK
    B, s_size = x.shape
    assert s_size == layout["s_size"]
    a_pad = layout["a_pad"]
    h_pad = layout["h_pad"]
    r_total, w_pad = params.shape

    # Batch tiling: big tiles amortize the ~0.35us/step pipeline overhead and
    # keep DMAs fat; always >= 2 evenly-sized blocks when B > 16 so both v7x
    # TensorCores get balanced work.  At the 1024-row cap each buffer (x tile
    # lane-padded to 128, bf16 out tile, params) is well under 1 MiB, far
    # below the 32 MiB scoped VMEM default even on v7x (64 MiB physical).
    b_padq = _round_up(B, BATCH_QUANTUM)
    if b_padq <= BATCH_QUANTUM:
        b_blk = BATCH_QUANTUM
    else:
        n_blocks = max(2, pl.cdiv(b_padq, b_block))
        if n_blocks % 2:          # even split across the two v7x TensorCores
            n_blocks += 1
        b_blk = _round_up(pl.cdiv(b_padq, n_blocks), BATCH_QUANTUM)
    b_pad = _round_up(B, b_blk)

    if b_pad != B:
        x = jnp.pad(x, ((0, b_pad - B), (0, 0)))
    x = x.astype(jnp.float32)

    grid = (b_pad // b_blk,)
    kernel = functools.partial(
        _policy_kernel,
        s_size=s_size, a_size=layout["a_size"], h_pad=h_pad, a_pad=a_pad,
        r_b1=layout["r_b1"], r_w2=layout["r_w2"], r_b2=layout["r_b2"])

    flops = 2 * b_pad * (s_size * h_pad + h_pad * a_pad)
    bytes_accessed = (4 * b_pad * s_size          # x (f32)
                      + 4 * r_total * w_pad       # packed params (f32)
                      + 2 * b_pad * a_pad)        # output (bf16)
    cost = pl.CostEstimate(flops=flops, transcendentals=b_pad * a_pad,
                           bytes_accessed=bytes_accessed)

    def _call(single_buffer_params):
        return pl.pallas_call(
            kernel,
            out_shape=jax.ShapeDtypeStruct((b_pad, a_pad), jnp.bfloat16),
            grid=grid,
            in_specs=[
                pl.BlockSpec((b_blk, s_size), lambda i: (i, 0)),      # x tile
                _params_spec(r_total, w_pad, single_buffer_params),   # params
            ],
            out_specs=pl.BlockSpec((b_blk, a_pad), lambda i: (i, 0)),
            compiler_params=pltpu.CompilerParams(
                dimension_semantics=("parallel",)),
            cost_estimate=cost,
        )(x, params)

    if _PARAMS_SINGLE_BUFFER_OK is None:
        try:
            out = _call(True)
            _PARAMS_SINGLE_BUFFER_OK = True
        except Exception:
            # Single-buffered params not supported on this jax version /
            # backend: fall back to the default double-buffered pipeline.
            _PARAMS_SINGLE_BUFFER_OK = False
            out = _call(False)
    else:
        out = _call(_PARAMS_SINGLE_BUFFER_OK)
    return out


def policy_probs(x, params, layout, *, b_block=1024):
    """Convenience API returning (B, a_size) f32 probabilities.

    Tiny batches (the Policy.act case) use a plain-jnp fast path since the
    fixed pallas_call dispatch cost dwarfs sub-microsecond compute there."""
    B = x.shape[0]
    a_size = layout["a_size"]
    if B <= _SMALL_BATCH_FASTPATH:
        s, h = layout["s_size"], layout["h_size"]
        w1 = params[0:s, 0:h]
        b1 = params[layout["r_b1"], 0:h]
        w2 = params[layout["r_w2"]:layout["r_w2"] + h, 0:a_size]
        b2 = params[layout["r_b2"], 0:a_size]
        hid = jnp.maximum(x.astype(jnp.float32) @ w1 + b1[None, :], 0.0)
        return jax.nn.softmax(hid @ w2 + b2[None, :], axis=1)

    padded = policy_forward_padded(x, params, layout, b_block=b_block)
    # NOTE: performance-sensitive consumers should use the padded block
    # directly (padded lanes carry exactly-zero probability); this slice
    # exists only for API convenience / testing.
    return padded[:B, :a_size].astype(jnp.float32)


# ----------------------------------------------------------------------------
# Deterministic init (mimics nn.Linear's uniform +-1/sqrt(fan_in)).
# ----------------------------------------------------------------------------
def init_params(key, s_size=4, h_size=16, a_size=2):
    k1, k2, k3, k4 = jax.random.split(key, 4)
    lim1 = 1.0 / jnp.sqrt(jnp.float32(s_size))
    lim2 = 1.0 / jnp.sqrt(jnp.float32(h_size))
    w1 = jax.random.uniform(k1, (s_size, h_size), jnp.float32, -lim1, lim1)
    b1 = jax.random.uniform(k2, (h_size,), jnp.float32, -lim1, lim1)
    w2 = jax.random.uniform(k3, (h_size, a_size), jnp.float32, -lim2, lim2)
    b2 = jax.random.uniform(k4, (a_size,), jnp.float32, -lim2, lim2)
    return w1, b1, w2, b2


def _reference(x, w1, b1, w2, b2):
    h = jnp.maximum(x @ w1 + b1[None, :], 0.0)
    logits = h @ w2 + b2[None, :]
    return jax.nn.softmax(logits, axis=1)


if __name__ == "__main__":
    key = jax.random.PRNGKey(0)
    kx, kb, kp = jax.random.split(key, 3)

    s_size, h_size, a_size = 4, 16, 2
    w1, b1, w2, b2 = init_params(kp, s_size, h_size, a_size)
    params, layout = pack_params(w1, b1, w2, b2)

    # --- tiny batch (Policy.act path): plain-jnp fast path, no kernel -------
    B = 2
    x = jax.random.normal(kx, (B, s_size), jnp.float32)
    probs_small = jax.block_until_ready(policy_probs(x, params, layout))
    ref_small = _reference(x, w1, b1, w2, b2)
    assert probs_small.shape == (B, a_size)
    assert jnp.allclose(probs_small, ref_small, atol=1e-4)

    # --- force the kernel on the tiny batch too (single 16-row block) -------
    padded_small = jax.block_until_ready(
        policy_forward_padded(x, params, layout))
    assert padded_small.shape[1] == layout["a_pad"]
    assert jnp.allclose(padded_small[:B, :a_size].astype(jnp.float32),
                        ref_small, atol=2e-2)

    # --- batched rollout: kernel path, 2 balanced "parallel" blocks ---------
    Bb = 300
    xb = jax.random.normal(kb, (Bb, s_size), jnp.float32)
    padded_b = jax.block_until_ready(
        policy_forward_padded(xb, params, layout))
    probs_b = padded_b[:Bb, :a_size].astype(jnp.float32)   # test-only slice
    ref_b = _reference(xb, w1, b1, w2, b2)
    assert jnp.allclose(jnp.sum(probs_b, axis=1), 1.0, atol=1e-2)
    assert jnp.allclose(probs_b, ref_b, atol=2e-2)
    # Padded action lanes carry (exactly) zero probability, so downstream
    # Categorical sampling can run directly on the padded block.
    assert float(jnp.max(jnp.abs(
        padded_b[:, a_size:].astype(jnp.float32)))) <= 1e-6

    # TODO(synk): Categorical sampling / log_prob from Policy.act stays outside
    # the kernel (host/JAX-side control flow, not part of forward()).

    print("KERNEL_OK")
</pallas_src>

<mosaic_0001>
module attributes {stable_mosaic.version = 11 : i64} {
  func.func @_policy_kernel(%arg0: i32, %arg1: memref<16x4xf32, #tpu.memory_space<vmem>>, %arg2: memref<152x128xf32, #tpu.memory_space<vmem>>, %arg3: memref<16x128xbf16, #tpu.memory_space<vmem>>) attributes {dimension_semantics = [#tpu.dimension_semantics<parallel>], iteration_bounds = array<i64: 1>, scalar_prefetch = 0 : i64, scratch_operands = 0 : i64, tpu.core_type = #tpu.core_type<tc>, window_params = [{transform_indices = @transform_0, window_bounds = array<i64: 16, 4>}, {pipeline_mode = #tpu.pipeline_mode<synchronous>, transform_indices = @transform_1, window_bounds = array<i64: 152, 128>}, {transform_indices = @transform_2, window_bounds = array<i64: 16, 128>}]} {
    %c0 = arith.constant 0 : index
    %c0_0 = arith.constant 0 : index
    %0 = vector.load %arg1[%c0, %c0_0] : memref<16x4xf32, #tpu.memory_space<vmem>>, vector<16x4xf32>
    %1 = arith.truncf %0 : vector<16x4xf32> to vector<16x4xbf16>
    %c0_1 = arith.constant 0 : index
    %c0_2 = arith.constant 0 : index
    %2 = vector.load %arg2[%c0_1, %c0_2] : memref<152x128xf32, #tpu.memory_space<vmem>>, vector<4x128xf32>
    %3 = arith.truncf %2 : vector<4x128xf32> to vector<4x128xbf16>
    %c8 = arith.constant 8 : index
    %c0_3 = arith.constant 0 : index
    %4 = vector.load %arg2[%c8, %c0_3] : memref<152x128xf32, #tpu.memory_space<vmem>>, vector<1x128xf32>
    %c16 = arith.constant 16 : index
    %c0_4 = arith.constant 0 : index
    %5 = vector.load %arg2[%c16, %c0_4] : memref<152x128xf32, #tpu.memory_space<vmem>>, vector<128x128xf32>
    %6 = arith.truncf %5 : vector<128x128xf32> to vector<128x128xbf16>
    %c144 = arith.constant 144 : index
    %c0_5 = arith.constant 0 : index
    %7 = vector.load %arg2[%c144, %c0_5] : memref<152x128xf32, #tpu.memory_space<vmem>>, vector<1x128xf32>
    %cst = arith.constant dense<0.000000e+00> : vector<16x128xf32>
    %8 = tpu.matmul %1, %3, %cst {dimension_numbers = #tpu.dot_dimension_numbers<[1], [0], [0], [1], [0, 0, 1, 1], [], []>} : vector<16x4xbf16>, vector<4x128xbf16>, vector<16x128xf32> -> vector<16x128xf32>
    %9 = vector.broadcast %4 : vector<1x128xf32> to vector<16x128xf32>
    %10 = arith.addf %8, %9 : vector<16x128xf32>
    %cst_6 = arith.constant 0.000000e+00 : f32
    %11 = vector.broadcast %cst_6 : f32 to vector<16x128xf32>
    %12 = arith.maximumf %10, %11 : vector<16x128xf32>
    %13 = arith.truncf %12 : vector<16x128xf32> to vector<16x128xbf16>
    %cst_7 = arith.constant dense<0.000000e+00> : vector<16x128xf32>
    %14 = tpu.matmul %13, %6, %cst_7 {dimension_numbers = #tpu.dot_dimension_numbers<[1], [0], [0], [1], [0, 0, 1, 1], [], []>} : vector<16x128xbf16>, vector<128x128xbf16>, vector<16x128xf32> -> vector<16x128xf32>
    %15 = vector.broadcast %7 : vector<1x128xf32> to vector<16x128xf32>
    %16 = arith.addf %14, %15 : vector<16x128xf32>
    %cst_8 = arith.constant dense<0xFF800000> : vector<16xf32>
    %17 = vector.multi_reduction <maximumf>, %16, %cst_8 [1] : vector<16x128xf32> to vector<16xf32>
    %18 = vector.shape_cast %17 : vector<16xf32> to vector<16x1xf32>
    %19 = vector.broadcast %18 : vector<16x1xf32> to vector<16x128xf32>
    %20 = arith.subf %16, %19 : vector<16x128xf32>
    %21 = math.exp %20 : vector<16x128xf32>
    %cst_9 = arith.constant dense<0.000000e+00> : vector<16xf32>
    %22 = vector.multi_reduction <add>, %21, %cst_9 [1] : vector<16x128xf32> to vector<16xf32>
    %23 = vector.shape_cast %22 : vector<16xf32> to vector<16x1xf32>
    %24 = tpu.reciprocal %23 {approx = true} : vector<16x1xf32> -> vector<16x1xf32>
    %25 = vector.broadcast %24 : vector<16x1xf32> to vector<16x128xf32>
    %26 = arith.mulf %21, %25 : vector<16x128xf32>
    %27 = arith.truncf %26 : vector<16x128xf32> to vector<16x128xbf16>
    %c0_10 = arith.constant 0 : index
    %c0_11 = arith.constant 0 : index
    %28 = vector.load %arg3[%c0_10, %c0_11] : memref<16x128xbf16, #tpu.memory_space<vmem>>, vector<16x128xbf16>
    tpu.vector_store %arg3[%c0_10, %c0_11], %27 {strides = array<i32>} : memref<16x128xbf16, #tpu.memory_space<vmem>>, vector<16x128xbf16>,
    return
  }
  func.func @transform_0(%arg0: i32) -> (i32, i32) {
    %c0_i32 = arith.constant 0 : i32
    %c0_i32_0 = arith.constant 0 : i32
    return %arg0, %c0_i32 : i32, i32
  }
  func.func @transform_1(%arg0: i32) -> (i32, i32) {
    %c0_i32 = arith.constant 0 : i32
    %c0_i32_0 = arith.constant 0 : i32
    %c0_i32_1 = arith.constant 0 : i32
    return %c0_i32, %c0_i32_0 : i32, i32
  }
  func.func @transform_2(%arg0: i32) -> (i32, i32) {
    %c0_i32 = arith.constant 0 : i32
    %c0_i32_0 = arith.constant 0 : i32
    return %arg0, %c0_i32 : i32, i32
  }
}

module attributes {stable_mosaic.version = 11 : i64} {
  func.func @_policy_kernel(%arg0: i32, %arg1: memref<16x4xf32, #tpu.memory_space<vmem>>, %arg2: memref<152x128xf32, #tpu.memory_space<vmem>>, %arg3: memref<16x128xbf16, #tpu.memory_space<vmem>>) attributes {dimension_semantics = [#tpu.dimension_semantics<parallel>], iteration_bounds = array<i64: 1>, scalar_prefetch = 0 : i64, scratch_operands = 0 : i64, tpu.core_type = #tpu.core_type<tc>, window_params = [{transform_indices = @transform_0, window_bounds = array<i64: 16, 4>}, {pipeline_mode = #tpu.pipeline_mode<synchronous>, transform_indices = @transform_1, window_bounds = array<i64: 152, 128>}, {transform_indices = @transform_2, window_bounds = array<i64: 16, 128>}]} {
    %c0 = arith.constant 0 : index
    %c0_0 = arith.constant 0 : index
    %0 = vector.load %arg1[%c0, %c0_0] : memref<16x4xf32, #tpu.memory_space<vmem>>, vector<16x4xf32>
    %1 = arith.truncf %0 : vector<16x4xf32> to vector<16x4xbf16>
    %c0_1 = arith.constant 0 : index
    %c0_2 = arith.constant 0 : index
    %2 = vector.load %arg2[%c0_1, %c0_2] : memref<152x128xf32, #tpu.memory_space<vmem>>, vector<4x128xf32>
    %3 = arith.truncf %2 : vector<4x128xf32> to vector<4x128xbf16>
    %c8 = arith.constant 8 : index
    %c0_3 = arith.constant 0 : index
    %4 = vector.load %arg2[%c8, %c0_3] : memref<152x128xf32, #tpu.memory_space<vmem>>, vector<1x128xf32>
    %c16 = arith.constant 16 : index
    %c0_4 = arith.constant 0 : index
    %5 = vector.load %arg2[%c16, %c0_4] : memref<152x128xf32, #tpu.memory_space<vmem>>, vector<128x128xf32>
    %6 = arith.truncf %5 : vector<128x128xf32> to vector<128x128xbf16>
    %c144 = arith.constant 144 : index
    %c0_5 = arith.constant 0 : index
    %7 = vector.load %arg2[%c144, %c0_5] : memref<152x128xf32, #tpu.memory_space<vmem>>, vector<1x128xf32>
    %cst = arith.constant dense<0.000000e+00> : vector<16x128xf32>
    %8 = tpu.matmul %1, %3, %cst {dimension_numbers = #tpu.dot_dimension_numbers<[1], [0], [0], [1], [0, 0, 1, 1], [], []>} : vector<16x4xbf16>, vector<4x128xbf16>, vector<16x128xf32> -> vector<16x128xf32>
    %9 = vector.broadcast %4 : vector<1x128xf32> to vector<16x128xf32>
    %10 = arith.addf %8, %9 : vector<16x128xf32>
    %cst_6 = arith.constant 0.000000e+00 : f32
    %11 = vector.broadcast %cst_6 : f32 to vector<16x128xf32>
    %12 = arith.maximumf %10, %11 : vector<16x128xf32>
    %13 = arith.truncf %12 : vector<16x128xf32> to vector<16x128xbf16>
    %cst_7 = arith.constant dense<0.000000e+00> : vector<16x128xf32>
    %14 = tpu.matmul %13, %6, %cst_7 {dimension_numbers = #tpu.dot_dimension_numbers<[1], [0], [0], [1], [0, 0, 1, 1], [], []>} : vector<16x128xbf16>, vector<128x128xbf16>, vector<16x128xf32> -> vector<16x128xf32>
    %15 = vector.broadcast %7 : vector<1x128xf32> to vector<16x128xf32>
    %16 = arith.addf %14, %15 : vector<16x128xf32>
    %cst_8 = arith.constant dense<0xFF800000> : vector<16xf32>
    %17 = vector.multi_reduction <maximumf>, %16, %cst_8 [1] : vector<16x128xf32> to vector<16xf32>
    %18 = vector.shape_cast %17 : vector<16xf32> to vector<16x1xf32>
    %19 = vector.broadcast %18 : vector<16x1xf32> to vector<16x128xf32>
    %20 = arith.subf %16, %19 : vector<16x128xf32>
    %21 = math.exp %20 : vector<16x128xf32>
    %cst_9 = arith.constant dense<0.000000e+00> : vector<16xf32>
    %22 = vector.multi_reduction <add>, %21, %cst_9 [1] : vector<16x128xf32> to vector<16xf32>
    %23 = vector.shape_cast %22 : vector<16xf32> to vector<16x1xf32>
    %24 = tpu.reciprocal %23 {approx = true} : vector<16x1xf32> -> vector<16x1xf32>
    %25 = vector.broadcast %24 : vector<16x1xf32> to vector<16x128xf32>
    %26 = arith.mulf %21, %25 : vector<16x128xf32>
    %27 = arith.truncf %26 : vector<16x128xf32> to vector<16x128xbf16>
    %c0_10 = arith.constant 0 : index
    %c0_11 = arith.constant 0 : index
    %28 = vector.load %arg3[%c0_10, %c0_11] : memref<16x128xbf16, #tpu.memory_space<vmem>>, vector<16x128xbf16>
    tpu.vector_store %arg3[%c0_10, %c0_11], %27 {strides = array<i32>} : memref<16x128xbf16, #tpu.memory_space<vmem>>, vector<16x128xbf16>,
    return
  }
  func.func @transform_0(%arg0: i32) -> (i32, i32) {
    %c0_i32 = arith.constant 0 : i32
    %c0_i32_0 = arith.constant 0 : i32
    return %arg0, %c0_i32 : i32, i32
  }
  func.func @transform_1(%arg0: i32) -> (i32, i32) {
    %c0_i32 = arith.constant 0 : i32
    %c0_i32_0 = arith.constant 0 : i32
    %c0_i32_1 = arith.constant 0 : i32
    return %c0_i32, %c0_i32_0 : i32, i32
  }
  func.func @transform_2(%arg0: i32) -> (i32, i32) {
    %c0_i32 = arith.constant 0 : i32
    %c0_i32_0 = arith.constant 0 : i32
    return %arg0, %c0_i32 : i32, i32
  }
}

</mosaic_0001>

<bundles_post_ra>
// kernel: tpu_custom_call.1
= control target key start
LH: loop header
LB: loop body
LE: loop exit
PB: predicated region body
PF: predicated region fallthrough
CT: control target
= control target key end

     0   :  { %7 = vsyncpa [#allocation3], 0  ;;  %s370_s0 = inlined_call_operand.vmem [shape: f32[16,4], index: 0, kind: input, shape index: {}]   ;;  %s371_s1 = inlined_call_operand.hbm [shape: f32[152,128], index: 1, kind: input, shape index: {}]   ;;  %s372_s2 = inlined_call_operand.hbm [shape: bf16[16,128], index: 2, kind: output, shape index: {}]  }
   0x1   :  { %8 = vsyncpa [#allocation4], 0  ;;  %s317_s9 = smov [#allocation2]   ;;  %s269_s13 = scalar_lea.hbm %s371_s1, 2432 }
   0x2   :  { %s16_s10 = sshll.u32 %s317_s9, 4  ;;  %p270_p0 = scmp.ne.s32.totalorder %s371_s1, %s269_s13  ;;  %s17_s10 = int_to_ptr.vmem [resolvable:$true] %s16_s10 }
   0x3   :  { %p273_p1 = scmp.lt.u32.totalorder %s269_s13, %s371_s1 }
   0x5   :  { %p275_p2 = pnand %p273_p1, %p270_p0 }
   0x7   :  { %278 = shalt.err (!%p275_p2)
}
   0x8   :  { %s279_s18 = scalar_lea.vmem %s17_s10, 2432  ;;  %p284_p4 = scmp.lt.s32.totalorder %s17_s10, %s17_s10 }
   0x9   :  { %p280_p3 = scmp.ne.s32.totalorder %s17_s10, %s279_s18  ;;  %p285_p5 = scmp.lt.s32.totalorder %s279_s18, %s279_s18 }
   0xb   :  { %p286_p6 = por %p285_p5, %p284_p4 }
   0xd   :  { %p287_p7 = pnand %p286_p6, %p280_p3 }
   0xf   :  { %290 = shalt.err (!%p287_p7)
}
  0x10   :  { %s318_s19 = smov 128   ;;  %s319_s20 = smov 8  }
  0x11   :  { %22 = dma.hbm_to_vmem [thread:$0]  %s371_s1, 2432, %s17_s10, [#allocation3], %s318_s19, %s318_s19, %s319_s20  }
  0x12   :  { %313 = dma.done.wait [#allocation3], 2432  }
  0x13   :  { %314 = vsyncadd [#allocation3], 4294964864  ;;  %v320_v0 = vmov 0.0   ;;  %vm321_vm0 = vmmov 0   ;;  %v30_v1 = vld [vmem:[#allocation2] sm:$0xf] }
  0x14   :  { %227 = vmatprep.subr.bf16.mxu0 %v320_v0  ;;  %229 = vmatprep.mubr.msk.bf16.mxu0 %vm321_vm0, %v320_v0  ;;  %vm66_vm1 = vcmask 1041408   ;;  %v27_v2 = vld [vmem:[%s370_s0] sm:$0xff]  ;;  %v28_v3 = vld [vmem:[%s370_s0 + $0x8] sm:$0xff]  ;;  %v31_v4 = vpack.c.bf16 %v30_v1, %v30_v1  ;;  %v33_v5 = vld [vmem:[#allocation2 + $0x10] sm:$0xff]  ;;  %vm62_vm2 = vcmask 31744   ;;  %s322_s0 = smov [#allocation5]  }
  0x15   :  { %233 = vmatprep.subr.bf16.mxu1 %v320_v0  ;;  %249 = vmatprep.mubr.msk.bf16.mxu1 %vm321_vm0, %v320_v0  ;;  %v34_v6 = vld [vmem:[#allocation2 + $0x18] sm:$0xff]  ;;  %v35_v7 = vld [vmem:[#allocation2 + $0x20] sm:$0xff]  ;;  %v36_v9 = vld [vmem:[#allocation2 + $0x28] sm:$0xff]  ;;  %v29_v11 = vpack.c.bf16 %v28_v3, %v27_v2  ;;  %s192_s1 = sshll.u32 %s322_s0, 4  ;;  %s193_s1 = int_to_ptr.vmem [resolvable:$true] %s192_s1 }
  0x16   :  { %v49_v8 = vpack.c.bf16 %v34_v6, %v33_v5  ;;  %v68_v10 = vsel %vm66_vm1, %v31_v4, 0  ;;  %v50_v12 = vpack.c.bf16 %v36_v9, %v35_v7  ;;  %v37_v13 = vld [vmem:[#allocation2 + $0x30] sm:$0xff]  ;;  %v38_v14 = vld [vmem:[#allocation2 + $0x38] sm:$0xff]  ;;  %v39_v16 = vld [vmem:[#allocation2 + $0x40] sm:$0xff]  ;;  %s291_s27 = scalar_lea.vmem %s193_s1, 128  ;;  %p296_p9 = scmp.lt.s32.totalorder %s193_s1, %s193_s1 }
  0x17   :  { %228 = vmatpush3.bf16.msra.mxu0 %v68_v10  ;;  %v51_v15 = vpack.c.bf16 %v38_v14, %v37_v13  ;;  %v40_v17 = vld [vmem:[#allocation2 + $0x48] sm:$0xff]  ;;  %v41_v19 = vld [vmem:[#allocation2 + $0x50] sm:$0xff]  ;;  %v42_v20 = vld [vmem:[#allocation2 + $0x58] sm:$0xff]  ;;  %p292_p8 = scmp.ne.s32.totalorder %s193_s1, %s291_s27  ;;  %p297_p10 = scmp.lt.s32.totalorder %s291_s27, %s291_s27 }
  0x18   :  { %234 = vmatpush3.bf16.msra.mxu1 %v49_v8  ;;  %v52_v18 = vpack.c.bf16 %v40_v17, %v39_v16  ;;  %v53_v21 = vpack.c.bf16 %v42_v20, %v41_v19  ;;  %v43_v22 = vld [vmem:[#allocation2 + $0x60] sm:$0xff]  ;;  %v44_v23 = vld [vmem:[#allocation2 + $0x68] sm:$0xff]  ;;  %v45_v25 = vld [vmem:[#allocation2 + $0x70] sm:$0xff] }
  0x19   :  { %235 = vmatprep.subr.bf16.mxu1 %v320_v0  ;;  %v54_v24 = vpack.c.bf16 %v44_v23, %v43_v22  ;;  %v46_v26 = vld [vmem:[#allocation2 + $0x78] sm:$0xff]  ;;  %v47_v28 = vld [vmem:[#allocation2 + $0x80] sm:$0xff]  ;;  %v48_v29 = vld [vmem:[#allocation2 + $0x88] sm:$0xff]  ;;  %p298_p11 = por %p297_p10, %p296_p9 }
  0x1a   :  { %230 = vmatmul.mubr.msk.bf16.vlgmr.msra.gmra.mrb[0].mxu0 %vm62_vm2, %v29_v11  ;;  %v55_v27 = vpack.c.bf16 %v46_v26, %v45_v25  ;;  %v56_v30 = vpack.c.bf16 %v48_v29, %v47_v28  ;;  %v204_v31 = vld [vmem:[#allocation2 + $0x8] ss:$0 sm:$0xff]  ;;  %v206_v41 = vld [vmem:[#allocation2 + $0x90] ss:$0 sm:$0xff] }
  0x1b   :  { %p299_p12 = pnand %p298_p11, %p292_p8 }
  0x1c   :  { %236 = vmatpush3.bf16.msra.mxu1 %v50_v12 }
  0x1d   :  { %237 = vmatprep.subr.bf16.mxu1 %v320_v0 }
  0x20   :  { %238 = vmatpush3.bf16.msra.mxu1 %v51_v15 }
  0x21   :  { %239 = vmatprep.subr.bf16.mxu1 %v320_v0 }
  0x24   :  { %240 = vmatpush3.bf16.msra.mxu1 %v52_v18 }
  0x25   :  { %241 = vmatprep.subr.bf16.mxu1 %v320_v0 }
  0x28   :  { %242 = vmatpush3.bf16.msra.mxu1 %v53_v21 }
  0x29   :  { %243 = vmatprep.subr.bf16.mxu1 %v320_v0 }
  0x2c   :  { %244 = vmatpush3.bf16.msra.mxu1 %v54_v24 }
  0x2d   :  { %245 = vmatprep.subr.bf16.mxu1 %v320_v0 }
  0x30   :  { %246 = vmatpush3.bf16.msra.mxu1 %v55_v27 }
  0x31   :  { %247 = vmatprep.subr.bf16.mxu1 %v320_v0 }
  0x34   :  { %248 = vmatpush3.bf16.msra.mxu1 %v56_v30 }
  0xed   :  { %v104_v32 = vpop.f32.mrb[0].mxu0 }
  0xee   :  { %v105_v33 = vadd.f32 %v204_v31, %v104_v32  ;;  %v231_v34 = vpop.f32.mrb[1].mxu0 }
  0xef   :  { %v107_v35 = vpop.f32.mrb[2].mxu0 }
  0xf0   :  { %v108_v36 = vadd.f32 %v204_v31, %v107_v35  ;;  %v232_v37 = vpop.f32.mrb[3].mxu0  ;;  %v111_v38 = vmax.f32 %v105_v33, 0.0 }
  0xf2   :  { %v112_v39 = vmax.f32 %v108_v36, 0.0 }
  0xf4   :  { %v113_v40 = vpack.c.bf16 %v112_v39, %v111_v38 }
  0xf6   :  { %250 = vmatmul.mubr.bf16.vlgmr.msra.gmra.mrb[0].mxu1 %v113_v40 }
 0x1c9   :  { %v152_v42 = vpop.f32.mrb[0].mxu1 }
 0x1ca   :  { %v153_v43 = vadd.f32 %v206_v41, %v152_v42  ;;  %v251_v44 = vpop.f32.mrb[1].mxu1 }
 0x1cb   :  { %v155_v45 = vpop.f32.mrb[2].mxu1 }
 0x1cc   :  { %159 = vmax.xlane.f32.xlu0 %v153_v43  ;;  %v252_v46 = vpop.f32.mrb[3].mxu1  ;;  %v156_v47 = vadd.f32 %v206_v41, %v155_v45 }
 0x1d0   :  { %161 = vmax.xlane.f32.xlu0 %v156_v47 }
 0x259   :  { %v160_v48 = vpop.xlane.xlu0 %159 }
 0x25a   :  { %v163_v49 = vsub.f32 %v153_v43, %v160_v48 }
 0x25c   :  { %v165_v50 = vmul.f32 1.442695, %v163_v49 }
 0x25d   :  { %v162_v51 = vpop.xlane.xlu0 %161 }
 0x25e   :  { %261 = vpow2.f32 %v165_v50  ;;  %v164_v52 = vsub.f32 %v156_v47, %v162_v51 }
 0x260   :  { %v167_v53 = vmul.f32 1.442695, %v164_v52 }
 0x262   :  { %263 = vpow2.f32 %v167_v53 }
 0x268   :  { %v262_v54 = vpop.eup %261 }
 0x269   :  { %169 = vadd.xlane.f32.xlu1 %v262_v54 }
 0x26c   :  { %v264_v55 = vpop.eup %263 }
 0x26d   :  { %171 = vadd.xlane.f32.xlu1 %v264_v55 }
 0x2f6   :  { %v170_v56 = vpop.xlane.xlu1 %169 }
 0x2f7   :  { %265 = vrcp.f32 %v170_v56 }
 0x2fa   :  { %v172_v57 = vpop.xlane.xlu1 %171 }
 0x2fb   :  { %267 = vrcp.f32 %v172_v57 }
 0x301   :  { %v266_v58 = vpop.eup %265 }
 0x302   :  { %v175_v60 = vmul.f32 %v266_v58, %v262_v54 }
 0x305   :  { %v268_v59 = vpop.eup %267 }
 0x306   :  { %v176_v61 = vmul.f32 %v268_v59, %v264_v55 }
 0x308   :  { %v214_v62 = vpack.c.bf16 %v176_v61, %v175_v60 }
 0x30a   :  { %215 = vst [vmem:[#allocation5] sm:$0xff] %v214_v62  }
 0x30b   :  { %302 = shalt.err (!%p299_p12)
}
 0x30c   :  { %s303_s30 = scalar_lea.hbm %s372_s2, 128 }
 0x30d   :  { %p304_p13 = scmp.ne.s32.totalorder %s372_s2, %s303_s30  ;;  %p307_p0 = scmp.lt.u32.totalorder %s303_s30, %s372_s2 }
 0x30f   :  { %p309_p1 = pnand %p307_p0, %p304_p13 }
 0x311   :  { %312 = shalt.err (!%p309_p1)
}
 0x312   :  { %s323_s7 = smov 64   ;;  %s324_s8 = smov 4  }
 0x313   :  { %198 = dma.vmem_to_hbm [thread:$0]  %s193_s1, 128, %s372_s2, [#allocation4], %s323_s7, %s323_s7, %s324_s8  }
 0x314   :  { %315 = dma.done.wait [#allocation4], 128  }
 0x315   :  { %316 = vsyncadd [#allocation4], 4294967168 }
 0x316   :  { %202 = vsyncpa [#allocation3], 1 }
 0x317   :  { %203 = vsyncpa [#allocation4], 1 }

// kernel: tpu_custom_call.1
= control target key start
LH: loop header
LB: loop body
LE: loop exit
PB: predicated region body
PF: predicated region fallthrough
CT: control target
= control target key end

     0   :  { %7 = vsyncpa [#allocation3], 0  ;;  %s370_s0 = inlined_call_operand.vmem [shape: f32[16,4], index: 0, kind: input, shape index: {}]   ;;  %s371_s1 = inlined_call_operand.hbm [shape: f32[152,128], index: 1, kind: input, shape index: {}]   ;;  %s372_s2 = inlined_call_operand.hbm [shape: bf16[16,128], index: 2, kind: output, shape index: {}]  }
   0x1   :  { %8 = vsyncpa [#allocation4], 0  ;;  %s317_s9 = smov [#allocation2]   ;;  %s269_s13 = scalar_lea.hbm %s371_s1, 2432 }
   0x2   :  { %s16_s10 = sshll.u32 %s317_s9, 4  ;;  %p270_p0 = scmp.ne.s32.totalorder %s371_s1, %s269_s13  ;;  %s17_s10 = int_to_ptr.vmem [resolvable:$true] %s16_s10 }
   0x3   :  { %p273_p1 = scmp.lt.u32.totalorder %s269_s13, %s371_s1 }
   0x5   :  { %p275_p2 = pnand %p273_p1, %p270_p0 }
   0x7   :  { %278 = shalt.err (!%p275_p2)
}
   0x8   :  { %s279_s18 = scalar_lea.vmem %s17_s10, 2432  ;;  %p284_p4 = scmp.lt.s32.totalorder %s17_s10, %s17_s10 }
   0x9   :  { %p280_p3 = scmp.ne.s32.totalorder %s17_s10, %s279_s18  ;;  %p285_p5 = scmp.lt.s32.totalorder %s279_s18, %s279_s18 }
   0xb   :  { %p286_p6 = por %p285_p5, %p284_p4 }
   0xd   :  { %p287_p7 = pnand %p286_p6, %p280_p3 }
   0xf   :  { %290 = shalt.err (!%p287_p7)
}
  0x10   :  { %s318_s19 = smov 128   ;;  %s319_s20 = smov 8  }
  0x11   :  { %22 = dma.hbm_to_vmem [thread:$0]  %s371_s1, 2432, %s17_s10, [#allocation3], %s318_s19, %s318_s19, %s319_s20  }
  0x12   :  { %313 = dma.done.wait [#allocation3], 2432  }
  0x13   :  { %314 = vsyncadd [#allocation3], 4294964864  ;;  %v320_v0 = vmov 0.0   ;;  %vm321_vm0 = vmmov 0   ;;  %v30_v1 = vld [vmem:[#allocation2] sm:$0xf] }
  0x14   :  { %227 = vmatprep.subr.bf16.mxu0 %v320_v0  ;;  %229 = vmatprep.mubr.msk.bf16.mxu0 %vm321_vm0, %v320_v0  ;;  %vm66_vm1 = vcmask 1041408   ;;  %v27_v2 = vld [vmem:[%s370_s0] sm:$0xff]  ;;  %v28_v3 = vld [vmem:[%s370_s0 + $0x8] sm:$0xff]  ;;  %v31_v4 = vpack.c.bf16 %v30_v1, %v30_v1  ;;  %v33_v5 = vld [vmem:[#allocation2 + $0x10] sm:$0xff]  ;;  %vm62_vm2 = vcmask 31744   ;;  %s322_s0 = smov [#allocation5]  }
  0x15   :  { %233 = vmatprep.subr.bf16.mxu1 %v320_v0  ;;  %249 = vmatprep.mubr.msk.bf16.mxu1 %vm321_vm0, %v320_v0  ;;  %v34_v6 = vld [vmem:[#allocation2 + $0x18] sm:$0xff]  ;;  %v35_v7 = vld [vmem:[#allocation2 + $0x20] sm:$0xff]  ;;  %v36_v9 = vld [vmem:[#allocation2 + $0x28] sm:$0xff]  ;;  %v29_v11 = vpack.c.bf16 %v28_v3, %v27_v2  ;;  %s192_s1 = sshll.u32 %s322_s0, 4  ;;  %s193_s1 = int_to_ptr.vmem [resolvable:$true] %s192_s1 }
  0x16   :  { %v49_v8 = vpack.c.bf16 %v34_v6, %v33_v5  ;;  %v68_v10 = vsel %vm66_vm1, %v31_v4, 0  ;;  %v50_v12 = vpack.c.bf16 %v36_v9, %v35_v7  ;;  %v37_v13 = vld [vmem:[#allocation2 + $0x30] sm:$0xff]  ;;  %v38_v14 = vld [vmem:[#allocation2 + $0x38] sm:$0xff]  ;;  %v39_v16 = vld [vmem:[#allocation2 + $0x40] sm:$0xff]  ;;  %s291_s27 = scalar_lea.vmem %s193_s1, 128  ;;  %p296_p9 = scmp.lt.s32.totalorder %s193_s1, %s193_s1 }
  0x17   :  { %228 = vmatpush3.bf16.msra.mxu0 %v68_v10  ;;  %v51_v15 = vpack.c.bf16 %v38_v14, %v37_v13  ;;  %v40_v17 = vld [vmem:[#allocation2 + $0x48] sm:$0xff]  ;;  %v41_v19 = vld [vmem:[#allocation2 + $0x50] sm:$0xff]  ;;  %v42_v20 = vld [vmem:[#allocation2 + $0x58] sm:$0xff]  ;;  %p292_p8 = scmp.ne.s32.totalorder %s193_s1, %s291_s27  ;;  %p297_p10 = scmp.lt.s32.totalorder %s291_s27, %s291_s27 }
  0x18   :  { %234 = vmatpush3.bf16.msra.mxu1 %v49_v8  ;;  %v52_v18 = vpack.c.bf16 %v40_v17, %v39_v16  ;;  %v53_v21 = vpack.c.bf16 %v42_v20, %v41_v19  ;;  %v43_v22 = vld [vmem:[#allocation2 + $0x60] sm:$0xff]  ;;  %v44_v23 = vld [vmem:[#allocation2 + $0x68] sm:$0xff]  ;;  %v45_v25 = vld [vmem:[#allocation2 + $0x70] sm:$0xff] }
  0x19   :  { %235 = vmatprep.subr.bf16.mxu1 %v320_v0  ;;  %v54_v24 = vpack.c.bf16 %v44_v23, %v43_v22  ;;  %v46_v26 = vld [vmem:[#allocation2 + $0x78] sm:$0xff]  ;;  %v47_v28 = vld [vmem:[#allocation2 + $0x80] sm:$0xff]  ;;  %v48_v29 = vld [vmem:[#allocation2 + $0x88] sm:$0xff]  ;;  %p298_p11 = por %p297_p10, %p296_p9 }
  0x1a   :  { %230 = vmatmul.mubr.msk.bf16.vlgmr.msra.gmra.mrb[0].mxu0 %vm62_vm2, %v29_v11  ;;  %v55_v27 = vpack.c.bf16 %v46_v26, %v45_v25  ;;  %v56_v30 = vpack.c.bf16 %v48_v29, %v47_v28  ;;  %v204_v31 = vld [vmem:[#allocation2 + $0x8] ss:$0 sm:$0xff]  ;;  %v206_v41 = vld [vmem:[#allocation2 + $0x90] ss:$0 sm:$0xff] }
  0x1b   :  { %p299_p12 = pnand %p298_p11, %p292_p8 }
  0x1c   :  { %236 = vmatpush3.bf16.msra.mxu1 %v50_v12 }
  0x1d   :  { %237 = vmatprep.subr.bf16.mxu1 %v320_v0 }
  0x20   :  { %238 = vmatpush3.bf16.msra.mxu1 %v51_v15 }
  0x21   :  { %239 = vmatprep.subr.bf16.mxu1 %v320_v0 }
  0x24   :  { %240 = vmatpush3.bf16.msra.mxu1 %v52_v18 }
  0x25   :  { %241 = vmatprep.subr.bf16.mxu1 %v320_v0 }
  0x28   :  { %242 = vmatpush3.bf16.msra.mxu1 %v53_v21 }
  0x29   :  { %243 = vmatprep.subr.bf16.mxu1 %v320_v0 }
  0x2c   :  { %244 = vmatpush3.bf16.msra.mxu1 %v54_v24 }
  0x2d   :  { %245 = vmatprep.subr.bf16.mxu1 %v320_v0 }
  0x30   :  { %246 = vmatpush3.bf16.msra.mxu1 %v55_v27 }
  0x31   :  { %247 = vmatprep.subr.bf16.mxu1 %v320_v0 }
  0x34   :  { %248 = vmatpush3.bf16.msra.mxu1 %v56_v30 }
  0xed   :  { %v104_v32 = vpop.f32.mrb[0].mxu0 }
  0xee   :  { %v105_v33 = vadd.f32 %v204_v31, %v104_v32  ;;  %v231_v34 = vpop.f32.mrb[1].mxu0 }
  0xef   :  { %v107_v35 = vpop.f32.mrb[2].mxu0 }
  0xf0   :  { %v108_v36 = vadd.f32 %v204_v31, %v107_v35  ;;  %v232_v37 = vpop.f32.mrb[3].mxu0  ;;  %v111_v38 = vmax.f32 %v105_v33, 0.0 }
  0xf2   :  { %v112_v39 = vmax.f32 %v108_v36, 0.0 }
  0xf4   :  { %v113_v40 = vpack.c.bf16 %v112_v39, %v111_v38 }
  0xf6   :  { %250 = vmatmul.mubr.bf16.vlgmr.msra.gmra.mrb[0].mxu1 %v113_v40 }
 0x1c9   :  { %v152_v42 = vpop.f32.mrb[0].mxu1 }
 0x1ca   :  { %v153_v43 = vadd.f32 %v206_v41, %v152_v42  ;;  %v251_v44 = vpop.f32.mrb[1].mxu1 }
 0x1cb   :  { %v155_v45 = vpop.f32.mrb[2].mxu1 }
 0x1cc   :  { %159 = vmax.xlane.f32.xlu0 %v153_v43  ;;  %v252_v46 = vpop.f32.mrb[3].mxu1  ;;  %v156_v47 = vadd.f32 %v206_v41, %v155_v45 }
 0x1d0   :  { %161 = vmax.xlane.f32.xlu0 %v156_v47 }
 0x259   :  { %v160_v48 = vpop.xlane.xlu0 %159 }
 0x25a   :  { %v163_v49 = vsub.f32 %v153_v43, %v160_v48 }
 0x25c   :  { %v165_v50 = vmul.f32 1.442695, %v163_v49 }
 0x25d   :  { %v162_v51 = vpop.xlane.xlu0 %161 }
 0x25e   :  { %261 = vpow2.f32 %v165_v50  ;;  %v164_v52 = vsub.f32 %v156_v47, %v162_v51 }
 0x260   :  { %v167_v53 = vmul.f32 1.442695, %v164_v52 }
 0x262   :  { %263 = vpow2.f32 %v167_v53 }
 0x268   :  { %v262_v54 = vpop.eup %261 }
 0x269   :  { %169 = vadd.xlane.f32.xlu1 %v262_v54 }
 0x26c   :  { %v264_v55 = vpop.eup %263 }
 0x26d   :  { %171 = vadd.xlane.f32.xlu1 %v264_v55 }
 0x2f6   :  { %v170_v56 = vpop.xlane.xlu1 %169 }
 0x2f7   :  { %265 = vrcp.f32 %v170_v56 }
 0x2fa   :  { %v172_v57 = vpop.xlane.xlu1 %171 }
 0x2fb   :  { %267 = vrcp.f32 %v172_v57 }
 0x301   :  { %v266_v58 = vpop.eup %265 }
 0x302   :  { %v175_v60 = vmul.f32 %v266_v58, %v262_v54 }
 0x305   :  { %v268_v59 = vpop.eup %267 }
 0x306   :  { %v176_v61 = vmul.f32 %v268_v59, %v264_v55 }
 0x308   :  { %v214_v62 = vpack.c.bf16 %v176_v61, %v175_v60 }
 0x30a   :  { %215 = vst [vmem:[#allocation5] sm:$0xff] %v214_v62  }
 0x30b   :  { %302 = shalt.err (!%p299_p12)
}
 0x30c   :  { %s303_s30 = scalar_lea.hbm %s372_s2, 128 }
 0x30d   :  { %p304_p13 = scmp.ne.s32.totalorder %s372_s2, %s303_s30  ;;  %p307_p0 = scmp.lt.u32.totalorder %s303_s30, %s372_s2 }
 0x30f   :  { %p309_p1 = pnand %p307_p0, %p304_p13 }
 0x311   :  { %312 = shalt.err (!%p309_p1)
}
 0x312   :  { %s323_s7 = smov 64   ;;  %s324_s8 = smov 4  }
 0x313   :  { %198 = dma.vmem_to_hbm [thread:$0]  %s193_s1, 128, %s372_s2, [#allocation4], %s323_s7, %s323_s7, %s324_s8  }
 0x314   :  { %315 = dma.done.wait [#allocation4], 128  }
 0x315   :  { %316 = vsyncadd [#allocation4], 4294967168 }
 0x316   :  { %202 = vsyncpa [#allocation3], 1 }
 0x317   :  { %203 = vsyncpa [#allocation4], 1 }

</bundles_post_ra>
